<compile_context>
chip_gen: v6e
topology: v6e:2x2x1
jax: 0.10.0
libtpu: 0.0.40
codegen_flags: <defaults>
</compile_context>

<pallas_src>
import functools

import jax
import jax.numpy as jnp
from jax.experimental import pallas as pl
from jax.experimental.pallas import tpu as pltpu


def _round_up(x, m):
    return ((x + m - 1) // m) * m


def _vmem_budget_bytes():
    """Conservative scoped-VMEM budget (bytes)."""
    cap = None
    try:
        info = pltpu.get_tpu_info()
        cap = getattr(info, "vmem_capacity_bytes", None)
    except Exception:
        cap = None
    if not cap:
        cap = 64 * 1024 * 1024          # v7x physical per-TC VMEM (safest floor)
    return int(0.75 * cap)


def _tensorcores_per_chip():
    """Best-effort: 2 for dual-TensorCore chips (v7x / v4), else 1."""
    try:
        kind = jax.devices()[0].device_kind.lower()
    except Exception:
        return 1
    return 2 if any(t in kind for t in ("7x", "v7", "v4", "v5p")) else 1


# ----------------------------- fused kernel --------------------------------

def _fc_fused_kernel(*refs, num_layers, compute_dtype):
    # refs = (x_ref, w0, b0, w1, b1, ..., w{L-1}, b{L-1}, o_ref)
    x_ref = refs[0]
    o_ref = refs[-1]
    wb = refs[1:-1]

    h = x_ref[...]                                    # (tm, in_dim), compute_dtype
    for l in range(num_layers):
        w = wb[2 * l][...]                            # (Kl, Nl), compute_dtype (pre-cast)
        b = wb[2 * l + 1][...]                        # (1, Nl), f32
        y = jnp.dot(h, w, preferred_element_type=jnp.float32) + b
        if l < num_layers - 1:                        # ReLU on hidden layers only
            y = jnp.maximum(y, 0.0)
            h = y.astype(compute_dtype)               # no-op when compute_dtype=f32
        else:
            h = y
    o_ref[...] = h.astype(o_ref.dtype)


# ------------------- fallback: per-layer tiled Linear ------------------------

def _linear_kernel(x_ref, w_ref, b_ref, o_ref, acc_ref, *, apply_relu):
    @pl.when(pl.program_id(2) == 0)
    def _():
        acc_ref[...] = jnp.zeros_like(acc_ref)

    acc_ref[...] += jnp.dot(x_ref[...], w_ref[...],
                            preferred_element_type=jnp.float32)

    @pl.when(pl.program_id(2) == pl.num_programs(2) - 1)
    def _():
        y = acc_ref[...] + b_ref[...]
        if apply_relu:
            y = jnp.maximum(y, 0.0)
        o_ref[...] = y.astype(o_ref.dtype)


def _pick_tile(d, candidates):
    for c in candidates:
        if d % c == 0:
            return c
    return d                                           # full extent (small / unaligned dim)


def _linear_pallas(x, w, b, *, apply_relu, tm, out_dtype):
    M, K = x.shape
    N = w.shape[1]
    tk = _pick_tile(K, (512, 256, 128))
    tn = _pick_tile(N, (256, 128))
    m_pad = _round_up(M, tm)
    if m_pad != M:
        x = jnp.pad(x, ((0, m_pad - M), (0, 0)))
    b2 = b.reshape(1, N)

    out = pl.pallas_call(
        functools.partial(_linear_kernel, apply_relu=apply_relu),
        out_shape=jax.ShapeDtypeStruct((m_pad, N), out_dtype),
        grid_spec=pltpu.PrefetchScalarGridSpec(
            num_scalar_prefetch=0,
            grid=(m_pad // tm, N // tn, K // tk),
            in_specs=[pl.BlockSpec((tm, tk), lambda i, j, k: (i, k)),
                      pl.BlockSpec((tk, tn), lambda i, j, k: (k, j)),
                      pl.BlockSpec((1, tn), lambda i, j, k: (0, j))],
            out_specs=pl.BlockSpec((tm, tn), lambda i, j, k: (i, j)),
            scratch_shapes=[pltpu.VMEM((tm, tn), jnp.float32)]),
        compiler_params=pltpu.CompilerParams(
            dimension_semantics=("parallel", "parallel", "arbitrary")),
    )(x, w, b2)
    return out[:M] if m_pad != M else out


def _fc_layerwise_fallback(params, x2, cdt, row_align, M):
    # TODO(synk): intermediate activations stream through HBM here; a fully
    # fused K/N-tiled variant would keep them resident for very large layers.
    num_layers = len(params)
    tm = min(256, _round_up(max(M, 1), row_align))
    h = x2
    for l, (w, b) in enumerate(params):
        last = (l == num_layers - 1)
        h = _linear_pallas(h, w.astype(cdt), b.astype(jnp.float32),
                           apply_relu=not last, tm=tm,
                           out_dtype=jnp.float32 if last else cdt)
    return h


# ------------------------------- wrapper ------------------------------------

def fc_forward_pallas(params, x, in_dim, num_hidden_layers, *,
                      max_tm=512, compute_dtype=jnp.float32,
                      force_fallback=False):
    """Equivalent of FC.forward: x.view(-1, in_dim) -> (L-1)x(Linear+ReLU) -> Linear."""
    num_layers = num_hidden_layers + 1
    assert len(params) == num_layers

    cdt = jnp.dtype(compute_dtype)
    row_align = 16 if cdt.itemsize < 4 else 8          # bf16 wants (16,128) tiles

    x2 = x.reshape(-1, in_dim).astype(cdt)
    M = x2.shape[0]

    # feature dims: in_dim / out_dim kept exact (full-extent lane blocks, no
    # HBM padding passes); hidden dims padded to lane-dense multiples of 128.
    dims = [in_dim] + [params[l][0].shape[1] for l in range(num_layers)]
    dims_pad = list(dims)
    for l in range(1, num_layers):                     # hidden dims only
        dims_pad[l] = _round_up(dims[l], 128)

    # pre-pad + pre-cast weights (compute_dtype) and biases (f32) once.
    padded_wb = []
    weight_bytes = 0
    for l, (w, b) in enumerate(params):
        kp, np_ = dims_pad[l], dims_pad[l + 1]
        wp = jnp.zeros((kp, np_), cdt).at[:w.shape[0], :w.shape[1]].set(w.astype(cdt))
        bp = jnp.zeros((1, np_), jnp.float32).at[:, :b.shape[0]].set(b.astype(jnp.float32))
        padded_wb += [wp, bp]
        weight_bytes += wp.size * wp.dtype.itemsize + bp.size * 4

    out_n = dims_pad[-1]                               # == out_dim (unpadded)
    budget = _vmem_budget_bytes()
    max_hidden = max(dims_pad[1:])
    # per-batch-row VMEM: double-buffered x tile + out tile + f32 intermediates
    per_row = (2 * dims_pad[0] * cdt.itemsize
               + 2 * out_n * 4
               + 4 * max_hidden * 4)
    resident = 2 * weight_bytes                        # assume pipeliner double-buffers

    if force_fallback or resident + row_align * per_row > budget:
        out = _fc_layerwise_fallback(params, x2, cdt, row_align, M)
        return out

    # --- batch tiling: biggest tile that fits the VMEM budget --------------
    tm = max(row_align, min(max_tm, (budget - resident) // per_row))
    tm = (tm // row_align) * row_align
    m_aligned = _round_up(M, row_align)
    tm = min(tm, m_aligned)
    # split into >=2 grid steps only on dual-TensorCore chips (v7x / v4)
    if (_tensorcores_per_chip() >= 2 and m_aligned > row_align
            and m_aligned // tm < 2):
        tm = _round_up(pl.cdiv(m_aligned, 2), row_align)

    m_pad = _round_up(M, tm)
    if m_pad != M:
        x2 = jnp.pad(x2, ((0, m_pad - M), (0, 0)))     # only when strictly needed

    grid = (m_pad // tm,)
    in_specs = [pl.BlockSpec((tm, dims_pad[0]), lambda i: (i, 0))]  # x tile
    for l in range(num_layers):
        kp, np_ = dims_pad[l], dims_pad[l + 1]
        in_specs.append(pl.BlockSpec((kp, np_), lambda i: (0, 0)))  # resident weight
        in_specs.append(pl.BlockSpec((1, np_), lambda i: (0, 0)))   # resident bias

    flops = int(sum(2 * m_pad * dims_pad[l] * dims_pad[l + 1]
                    for l in range(num_layers)))
    bytes_accessed = int(x2.size * x2.dtype.itemsize
                         + sum(p.size * p.dtype.itemsize for p in padded_wb)
                         + m_pad * out_n * 4)

    kernel = functools.partial(_fc_fused_kernel, num_layers=num_layers,
                               compute_dtype=cdt)

    out = pl.pallas_call(
        kernel,
        out_shape=jax.ShapeDtypeStruct((m_pad, out_n), jnp.float32),
        grid_spec=pltpu.PrefetchScalarGridSpec(
            num_scalar_prefetch=0,
            grid=grid,
            in_specs=in_specs,
            out_specs=pl.BlockSpec((tm, out_n), lambda i: (i, 0)),
        ),
        compiler_params=pltpu.CompilerParams(
            dimension_semantics=("parallel",),
            vmem_limit_bytes=budget),
        cost_estimate=pl.CostEstimate(flops=flops, transcendentals=0,
                                      bytes_accessed=bytes_accessed),
    )(x2, *padded_wb)

    return out[:M] if m_pad != M else out


# ------------------------------ param init ----------------------------------

def init_fc_params(key, in_dim, out_dim, num_hidden_layers, layer_size):
    """nn.Linear-style init; weights stored transposed as (in, out)."""
    dims = [in_dim] + [layer_size] * num_hidden_layers + [out_dim]
    params = []
    for i in range(len(dims) - 1):
        fan_in, fan_out = dims[i], dims[i + 1]
        key, kw, kb = jax.random.split(key, 3)
        bound = 1.0 / jnp.sqrt(jnp.float32(fan_in))
        w = jax.random.uniform(kw, (fan_in, fan_out), jnp.float32, -bound, bound)
        b = jax.random.uniform(kb, (fan_out,), jnp.float32, -bound, bound)
        params.append((w, b))
    return params


# --------------------------------- main --------------------------------------

if __name__ == "__main__":
    in_dim = 16
    out_dim = 8
    num_hidden_layers = 2
    layer_size = 32

    key = jax.random.PRNGKey(0)
    k_param, k_x = jax.random.split(key)

    params = init_fc_params(k_param, in_dim, out_dim, num_hidden_layers,
                            layer_size)

    # Example input: (4, 8, 16) -> flattened internally to (32, 16).
    x = jax.random.normal(k_x, (4, 8, in_dim), dtype=jnp.float32)

    # Pure-JAX reference.
    ref = x.reshape(-1, in_dim)
    for i in range(num_hidden_layers):
        w, b = params[i]
        ref = jnp.maximum(ref @ w + b, 0.0)
    w, b = params[num_hidden_layers]
    ref = ref @ w + b

    # f32 fused path (default): bit-tight against reference.
    out = fc_forward_pallas(params, x, in_dim, num_hidden_layers)
    jax.block_until_ready(out)
    assert out.shape == (32, out_dim)
    assert jnp.allclose(out, ref, atol=1e-5, rtol=1e-5)

    # bf16 MXU-operand path (speed switch on all chips): looser tolerance.
    out_bf16 = fc_forward_pallas(params, x, in_dim, num_hidden_layers,
                                 compute_dtype=jnp.bfloat16)
    jax.block_until_ready(out_bf16)
    assert jnp.allclose(out_bf16, ref, atol=1e-1, rtol=1e-1)

    # Layer-wise tiled fallback path (used when weights exceed the VMEM
    # budget); forced here so both code paths are exercised.
    out_fb = fc_forward_pallas(params, x, in_dim, num_hidden_layers,
                               force_fallback=True)
    jax.block_until_ready(out_fb)
    assert jnp.allclose(out_fb, ref, atol=1e-5, rtol=1e-5)

    print("KERNEL_OK")
</pallas_src>

<mosaic_0001>
module attributes {stable_mosaic.version = 11 : i64} {
  func.func @_fc_fused_kernel(%arg0: i32, %arg1: memref<32x16xf32, #tpu.memory_space<vmem>>, %arg2: memref<16x128xf32, #tpu.memory_space<vmem>>, %arg3: memref<1x128xf32, #tpu.memory_space<vmem>>, %arg4: memref<128x128xf32, #tpu.memory_space<vmem>>, %arg5: memref<1x128xf32, #tpu.memory_space<vmem>>, %arg6: memref<128x8xf32, #tpu.memory_space<vmem>>, %arg7: memref<1x8xf32, #tpu.memory_space<vmem>>, %arg8: memref<32x8xf32, #tpu.memory_space<vmem>>) attributes {dimension_semantics = [#tpu.dimension_semantics<parallel>], iteration_bounds = array<i64: 1>, scalar_prefetch = 0 : i64, scratch_operands = 0 : i64, tpu.core_type = #tpu.core_type<tc>, window_params = [{transform_indices = @transform_0, window_bounds = array<i64: 32, 16>}, {pipeline_mode = #tpu.pipeline_mode<synchronous>, transform_indices = @transform_1, window_bounds = array<i64: 16, 128>}, {pipeline_mode = #tpu.pipeline_mode<synchronous>, transform_indices = @transform_2, window_bounds = array<i64: 1, 128>}, {pipeline_mode = #tpu.pipeline_mode<synchronous>, transform_indices = @transform_3, window_bounds = array<i64: 128, 128>}, {pipeline_mode = #tpu.pipeline_mode<synchronous>, transform_indices = @transform_4, window_bounds = array<i64: 1, 128>}, {pipeline_mode = #tpu.pipeline_mode<synchronous>, transform_indices = @transform_5, window_bounds = array<i64: 128, 8>}, {pipeline_mode = #tpu.pipeline_mode<synchronous>, transform_indices = @transform_6, window_bounds = array<i64: 1, 8>}, {transform_indices = @transform_7, window_bounds = array<i64: 32, 8>}]} {
    %c0 = arith.constant 0 : index
    %c0_0 = arith.constant 0 : index
    %0 = vector.load %arg1[%c0, %c0_0] : memref<32x16xf32, #tpu.memory_space<vmem>>, vector<32x16xf32>
    %c0_1 = arith.constant 0 : index
    %c0_2 = arith.constant 0 : index
    %1 = vector.load %arg2[%c0_1, %c0_2] : memref<16x128xf32, #tpu.memory_space<vmem>>, vector<16x128xf32>
    %c0_3 = arith.constant 0 : index
    %c0_4 = arith.constant 0 : index
    %2 = vector.load %arg3[%c0_3, %c0_4] : memref<1x128xf32, #tpu.memory_space<vmem>>, vector<1x128xf32>
    %cst = arith.constant dense<0.000000e+00> : vector<32x128xf32>
    %3 = tpu.matmul %0, %1, %cst {dimension_numbers = #tpu.dot_dimension_numbers<[1], [0], [0], [1], [0, 0, 1, 1], [], []>} : vector<32x16xf32>, vector<16x128xf32>, vector<32x128xf32> -> vector<32x128xf32>
    %4 = vector.broadcast %2 : vector<1x128xf32> to vector<32x128xf32>
    %5 = arith.addf %3, %4 : vector<32x128xf32>
    %cst_5 = arith.constant 0.000000e+00 : f32
    %6 = vector.broadcast %cst_5 : f32 to vector<32x128xf32>
    %7 = arith.maximumf %5, %6 : vector<32x128xf32>
    %c0_6 = arith.constant 0 : index
    %c0_7 = arith.constant 0 : index
    %8 = vector.load %arg4[%c0_6, %c0_7] : memref<128x128xf32, #tpu.memory_space<vmem>>, vector<128x128xf32>
    %c0_8 = arith.constant 0 : index
    %c0_9 = arith.constant 0 : index
    %9 = vector.load %arg5[%c0_8, %c0_9] : memref<1x128xf32, #tpu.memory_space<vmem>>, vector<1x128xf32>
    %cst_10 = arith.constant dense<0.000000e+00> : vector<32x128xf32>
    %10 = tpu.matmul %7, %8, %cst_10 {dimension_numbers = #tpu.dot_dimension_numbers<[1], [0], [0], [1], [0, 0, 1, 1], [], []>} : vector<32x128xf32>, vector<128x128xf32>, vector<32x128xf32> -> vector<32x128xf32>
    %11 = vector.broadcast %9 : vector<1x128xf32> to vector<32x128xf32>
    %12 = arith.addf %10, %11 : vector<32x128xf32>
    %cst_11 = arith.constant 0.000000e+00 : f32
    %13 = vector.broadcast %cst_11 : f32 to vector<32x128xf32>
    %14 = arith.maximumf %12, %13 : vector<32x128xf32>
    %c0_12 = arith.constant 0 : index
    %c0_13 = arith.constant 0 : index
    %15 = vector.load %arg6[%c0_12, %c0_13] : memref<128x8xf32, #tpu.memory_space<vmem>>, vector<128x8xf32>
    %c0_14 = arith.constant 0 : index
    %c0_15 = arith.constant 0 : index
    %16 = vector.load %arg7[%c0_14, %c0_15] : memref<1x8xf32, #tpu.memory_space<vmem>>, vector<1x8xf32>
    %cst_16 = arith.constant dense<0.000000e+00> : vector<32x8xf32>
    %17 = tpu.matmul %14, %15, %cst_16 {dimension_numbers = #tpu.dot_dimension_numbers<[1], [0], [0], [1], [0, 0, 1, 1], [], []>} : vector<32x128xf32>, vector<128x8xf32>, vector<32x8xf32> -> vector<32x8xf32>
    %18 = vector.broadcast %16 : vector<1x8xf32> to vector<32x8xf32>
    %19 = arith.addf %17, %18 : vector<32x8xf32>
    %c0_17 = arith.constant 0 : index
    %c0_18 = arith.constant 0 : index
    %20 = vector.load %arg8[%c0_17, %c0_18] : memref<32x8xf32, #tpu.memory_space<vmem>>, vector<32x8xf32>
    tpu.vector_store %arg8[%c0_17, %c0_18], %19 {strides = array<i32>} : memref<32x8xf32, #tpu.memory_space<vmem>>, vector<32x8xf32>,
    return
  }
  func.func @transform_0(%arg0: i32) -> (i32, i32) {
    %c0_i32 = arith.constant 0 : i32
    %c0_i32_0 = arith.constant 0 : i32
    return %arg0, %c0_i32 : i32, i32
  }
  func.func @transform_1(%arg0: i32) -> (i32, i32) {
    %c0_i32 = arith.constant 0 : i32
    %c0_i32_0 = arith.constant 0 : i32
    %c0_i32_1 = arith.constant 0 : i32
    return %c0_i32, %c0_i32_0 : i32, i32
  }
  func.func @transform_2(%arg0: i32) -> (i32, i32) {
    %c0_i32 = arith.constant 0 : i32
    %c0_i32_0 = arith.constant 0 : i32
    %c0_i32_1 = arith.constant 0 : i32
    return %c0_i32, %c0_i32_0 : i32, i32
  }
  func.func @transform_3(%arg0: i32) -> (i32, i32) {
    %c0_i32 = arith.constant 0 : i32
    %c0_i32_0 = arith.constant 0 : i32
    %c0_i32_1 = arith.constant 0 : i32
    return %c0_i32, %c0_i32_0 : i32, i32
  }
  func.func @transform_4(%arg0: i32) -> (i32, i32) {
    %c0_i32 = arith.constant 0 : i32
    %c0_i32_0 = arith.constant 0 : i32
    %c0_i32_1 = arith.constant 0 : i32
    return %c0_i32, %c0_i32_0 : i32, i32
  }
  func.func @transform_5(%arg0: i32) -> (i32, i32) {
    %c0_i32 = arith.constant 0 : i32
    %c0_i32_0 = arith.constant 0 : i32
    %c0_i32_1 = arith.constant 0 : i32
    return %c0_i32, %c0_i32_0 : i32, i32
  }
  func.func @transform_6(%arg0: i32) -> (i32, i32) {
    %c0_i32 = arith.constant 0 : i32
    %c0_i32_0 = arith.constant 0 : i32
    %c0_i32_1 = arith.constant 0 : i32
    return %c0_i32, %c0_i32_0 : i32, i32
  }
  func.func @transform_7(%arg0: i32) -> (i32, i32) {
    %c0_i32 = arith.constant 0 : i32
    %c0_i32_0 = arith.constant 0 : i32
    return %arg0, %c0_i32 : i32, i32
  }
}

</mosaic_0001>

<bundles_post_ra>
// kernel: tpu_custom_call.1
= control target key start
LH: loop header
LB: loop body
LE: loop exit
PB: predicated region body
PF: predicated region fallthrough
CT: control target
= control target key end

     0   :  { %vm39_vm0 = vcmask 130048   ;;  %vm361_vm1 = vcmask 64512   ;;  %s688_s1 = inlined_call_operand.vmem [shape: f32[16,128], index: 1, kind: input, shape index: {}]   ;;  %s689_s0 = inlined_call_operand.vmem [shape: f32[32,16], index: 0, kind: input, shape index: {}]   ;;  %s690_s3 = inlined_call_operand.vmem [shape: f32[128,128], index: 3, kind: input, shape index: {}]   ;;  %s691_s5 = inlined_call_operand.vmem [shape: f32[128,8], index: 5, kind: input, shape index: {}]   ;;  %s692_s2 = inlined_call_operand.vmem [shape: f32[1,128], index: 2, kind: input, shape index: {}]   ;;  %s693_s4 = inlined_call_operand.vmem [shape: f32[1,128], index: 4, kind: input, shape index: {}]   ;;  %s694_s6 = inlined_call_operand.vmem [shape: f32[1,8], index: 6, kind: input, shape index: {}]   ;;  %s695_s7 = inlined_call_operand.vmem [shape: f32[32,8], index: 7, kind: output, shape index: {}]  }
   0x1   :  { %v31_v0 = vld [vmem:[%s688_s1 + $0x8] sm:$0xff]  ;;  %v30_v1 = vld [vmem:[%s688_s1] sm:$0xff]  ;;  %v156_v4 = vld [vmem:[%s690_s3 + $0x78] sm:$0xff] }
   0x2   :  { %v26_v2 = vld [vmem:[%s689_s0] sm:$0xff]  ;;  %423 = vmatprep.subr.mxu0 %v31_v0  ;;  %v27_v3 = vld [vmem:[%s689_s0 + $0x8] sm:$0xff]  ;;  %v155_v5 = vld [vmem:[%s690_s3 + $0x70] sm:$0xff]  ;;  %433 = vmatprep.subr.mxu1 %v156_v4 }
   0x3   :  { %427 = vmatprep.mubr.msk.f32.mxu0 %vm39_vm0, %v26_v2  ;;  %424 = vmatpush3.msra.mxu0 %v31_v0  ;;  %v28_v6 = vld [vmem:[%s689_s0 + $0x10] sm:$0xff]  ;;  %v154_v7 = vld [vmem:[%s690_s3 + $0x68] sm:$0xff]  ;;  %v29_v8 = vld [vmem:[%s689_s0 + $0x18] sm:$0xff] }
   0x4   :  { %425 = vmatprep.subr.mxu0 %v30_v1  ;;  %434 = vmatpush3.msra.mxu1 %v156_v4  ;;  %v153_v9 = vld [vmem:[%s690_s3 + $0x60] sm:$0xff]  ;;  %v152_v10 = vld [vmem:[%s690_s3 + $0x58] sm:$0xff]  ;;  %v151_v11 = vld [vmem:[%s690_s3 + $0x50] sm:$0xff] }
   0x5   :  { %426 = vmatpush3.msra.mxu0 %v30_v1  ;;  %435 = vmatprep.subr.mxu1 %v155_v5  ;;  %v150_v12 = vld [vmem:[%s690_s3 + $0x48] sm:$0xff]  ;;  %v149_v13 = vld [vmem:[%s690_s3 + $0x40] sm:$0xff]  ;;  %v148_v14 = vld [vmem:[%s690_s3 + $0x38] sm:$0xff] }
   0x6   :  { %428 = vmatmul.mubr.msk.f32.vlgmr.msra.gmra.mxu0 %vm39_vm0, %v27_v3  ;;  %436 = vmatpush3.msra.mxu1 %v155_v5  ;;  %v147_v15 = vld [vmem:[%s690_s3 + $0x30] sm:$0xff]  ;;  %v146_v16 = vld [vmem:[%s690_s3 + $0x28] sm:$0xff]  ;;  %v145_v17 = vld [vmem:[%s690_s3 + $0x20] sm:$0xff] }
   0x7   :  { %430 = vmatprep.mubr.msk.f32.mxu0 %vm39_vm0, %v28_v6  ;;  %437 = vmatprep.subr.mxu1 %v154_v7  ;;  %v144_v18 = vld [vmem:[%s690_s3 + $0x18] sm:$0xff]  ;;  %v143_v19 = vld [vmem:[%s690_s3 + $0x10] sm:$0xff]  ;;  %v142_v20 = vld [vmem:[%s690_s3 + $0x8] sm:$0xff] }
   0x8   :  { %438 = vmatpush3.msra.mxu1 %v154_v7  ;;  %v141_v21 = vld [vmem:[%s690_s3] sm:$0xff]  ;;  %v268_v22 = vld [vmem:[%s691_s5 + $0x78] sm:$0xff]  ;;  %v267_v23 = vld [vmem:[%s691_s5 + $0x70] sm:$0xff] }
   0x9   :  { %439 = vmatprep.subr.mxu1 %v153_v9  ;;  %471 = vmatprep.subr.mxu0 %v268_v22  ;;  %v266_v24 = vld [vmem:[%s691_s5 + $0x68] sm:$0xff]  ;;  %v265_v25 = vld [vmem:[%s691_s5 + $0x60] sm:$0xff]  ;;  %v264_v26 = vld [vmem:[%s691_s5 + $0x58] sm:$0xff] }
   0xa   :  { %431 = vmatmul.mubr.msk.f32.gmra.mxu0 %vm39_vm0, %v29_v8  ;;  %440 = vmatpush3.msra.mxu1 %v153_v9  ;;  %v263_v27 = vld [vmem:[%s691_s5 + $0x50] sm:$0xff]  ;;  %v262_v28 = vld [vmem:[%s691_s5 + $0x48] sm:$0xff]  ;;  %v261_v29 = vld [vmem:[%s691_s5 + $0x40] sm:$0xff] }
   0xb   :  { %441 = vmatprep.subr.mxu1 %v152_v10  ;;  %472 = vmatpush3.msra.mxu0 %v268_v22  ;;  %v260_v30 = vld [vmem:[%s691_s5 + $0x38] sm:$0xff]  ;;  %v259_v31 = vld [vmem:[%s691_s5 + $0x30] sm:$0xff]  ;;  %v258_v32 = vld [vmem:[%s691_s5 + $0x28] sm:$0xff] }
   0xc   :  { %442 = vmatpush3.msra.mxu1 %v152_v10  ;;  %473 = vmatprep.subr.mxu0 %v267_v23  ;;  %v257_v33 = vld [vmem:[%s691_s5 + $0x20] sm:$0xff]  ;;  %v256_v47 = vld [vmem:[%s691_s5 + $0x18] sm:$0xff]  ;;  %v255_v48 = vld [vmem:[%s691_s5 + $0x10] sm:$0xff] }
   0xd   :  { %443 = vmatprep.subr.mxu1 %v151_v11  ;;  %474 = vmatpush3.msra.mxu0 %v267_v23  ;;  %v370_v34 = vld [vmem:[%s692_s2] ss:$0 sm:$0xff]  ;;  %v254_v49 = vld [vmem:[%s691_s5 + $0x8] sm:$0xff] }
   0xe   :  { %444 = vmatpush3.msra.mxu1 %v151_v11  ;;  %475 = vmatprep.subr.mxu0 %v266_v24  ;;  %v253_v50 = vld [vmem:[%s691_s5] sm:$0xff] }
   0xf   :  { %445 = vmatprep.subr.mxu1 %v150_v12  ;;  %476 = vmatpush3.msra.mxu0 %v266_v24  ;;  %v375_v51 = vld [vmem:[%s693_s4] ss:$0 sm:$0xff] }
  0x10   :  { %446 = vmatpush3.msra.mxu1 %v150_v12  ;;  %477 = vmatprep.subr.mxu0 %v265_v25  ;;  %v376_v0 = vld [vmem:[%s694_s6] ss:$0 sm:$0xff] }
  0x11   :  { %447 = vmatprep.subr.mxu1 %v149_v13  ;;  %478 = vmatpush3.msra.mxu0 %v265_v25 }
  0x12   :  { %448 = vmatpush3.msra.mxu1 %v149_v13  ;;  %479 = vmatprep.subr.mxu0 %v264_v26 }
  0x13   :  { %449 = vmatprep.subr.mxu1 %v148_v14  ;;  %480 = vmatpush3.msra.mxu0 %v264_v26 }
  0x14   :  { %450 = vmatpush3.msra.mxu1 %v148_v14  ;;  %481 = vmatprep.subr.mxu0 %v263_v27 }
  0x15   :  { %451 = vmatprep.subr.mxu1 %v147_v15  ;;  %482 = vmatpush3.msra.mxu0 %v263_v27 }
  0x16   :  { %452 = vmatpush3.msra.mxu1 %v147_v15  ;;  %483 = vmatprep.subr.mxu0 %v262_v28 }
  0x17   :  { %453 = vmatprep.subr.mxu1 %v146_v16  ;;  %484 = vmatpush3.msra.mxu0 %v262_v28 }
  0x18   :  { %454 = vmatpush3.msra.mxu1 %v146_v16  ;;  %485 = vmatprep.subr.mxu0 %v261_v29 }
  0x19   :  { %455 = vmatprep.subr.mxu1 %v145_v17  ;;  %486 = vmatpush3.msra.mxu0 %v261_v29 }
  0x1a   :  { %456 = vmatpush3.msra.mxu1 %v145_v17  ;;  %487 = vmatprep.subr.mxu0 %v260_v30 }
  0x1b   :  { %457 = vmatprep.subr.mxu1 %v144_v18  ;;  %488 = vmatpush3.msra.mxu0 %v260_v30 }
  0x1c   :  { %458 = vmatpush3.msra.mxu1 %v144_v18  ;;  %489 = vmatprep.subr.mxu0 %v259_v31 }
  0x1d   :  { %459 = vmatprep.subr.mxu1 %v143_v19  ;;  %490 = vmatpush3.msra.mxu0 %v259_v31 }
  0x1e   :  { %460 = vmatpush3.msra.mxu1 %v143_v19  ;;  %491 = vmatprep.subr.mxu0 %v258_v32 }
  0x1f   :  { %461 = vmatprep.subr.mxu1 %v142_v20  ;;  %492 = vmatpush3.msra.mxu0 %v258_v32 }
  0x20   :  { %462 = vmatpush3.msra.mxu1 %v142_v20  ;;  %493 = vmatprep.subr.mxu0 %v257_v33 }
  0x21   :  { %463 = vmatprep.subr.mxu1 %v141_v21  ;;  %494 = vmatpush3.msra.mxu0 %v257_v33 }
  0x22   :  { %464 = vmatpush3.msra.mxu1 %v141_v21  ;;  %495 = vmatprep.subr.mxu0 %v256_v47 }
  0x23   :  { %496 = vmatpush3.msra.mxu0 %v256_v47 }
  0x24   :  { %497 = vmatprep.subr.mxu0 %v255_v48 }
  0x25   :  { %498 = vmatpush3.msra.mxu0 %v255_v48 }
  0x26   :  { %499 = vmatprep.subr.mxu0 %v254_v49 }
  0x27   :  { %500 = vmatpush3.msra.mxu0 %v254_v49 }
  0x28   :  { %501 = vmatprep.subr.mxu0 %v253_v50 }
  0x29   :  { %502 = vmatpush3.msra.mxu0 %v253_v50 }
  0xc6   :  { %v429_v35 = vpop.f32.mrf.mxu0 }
  0xc7   :  { %v124_v36 = vadd.f32 %v429_v35, %v370_v34 }
  0xc8   :  { %v118_v37 = vpop.f32.mrf.mxu0 }
  0xc9   :  { %v119_v38 = vadd.f32 %v370_v34, %v118_v37  ;;  %v138_v41 = vmax.f32 %v124_v36, 0.0 }
  0xca   :  { %v432_v39 = vpop.f32.mrf.mxu0 }
  0xcb   :  { %v137_v40 = vmax.f32 %v119_v38, 0.0  ;;  %v134_v42 = vadd.f32 %v432_v39, %v370_v34 }
  0xcc   :  { %v128_v43 = vpop.f32.mrf.mxu0 }
  0xcd   :  { %v129_v44 = vadd.f32 %v370_v34, %v128_v43  ;;  %465 = vmatprep.mubr.f32.mxu1 %v137_v40  ;;  %v140_v46 = vmax.f32 %v134_v42, 0.0 }
  0xce   :  { %466 = vmatmul.mubr.f32.vlgmr.msra.gmra.mxu1 %v138_v41 }
  0xcf   :  { %v139_v45 = vmax.f32 %v129_v44, 0.0 }
  0xd1   :  { %468 = vmatprep.mubr.f32.mxu1 %v139_v45 }
  0xd2   :  { %469 = vmatmul.mubr.f32.gmra.mxu1 %v140_v46 }
 0x18e   :  { %v467_v52 = vpop.f32.mrf.mxu1 }
 0x18f   :  { %v236_v53 = vadd.f32 %v467_v52, %v375_v51 }
 0x190   :  { %v230_v54 = vpop.f32.mrf.mxu1 }
 0x191   :  { %v231_v55 = vadd.f32 %v375_v51, %v230_v54  ;;  %v250_v58 = vmax.f32 %v236_v53, 0.0 }
 0x192   :  { %v470_v56 = vpop.f32.mrf.mxu1 }
 0x193   :  { %v249_v57 = vmax.f32 %v231_v55, 0.0  ;;  %v246_v59 = vadd.f32 %v470_v56, %v375_v51 }
 0x194   :  { %v240_v60 = vpop.f32.mrf.mxu1 }
 0x195   :  { %v241_v61 = vadd.f32 %v375_v51, %v240_v60  ;;  %503 = vmatprep.mubr.f32.mxu0 %v249_v57  ;;  %v252_v63 = vmax.f32 %v246_v59, 0.0 }
 0x196   :  { %504 = vmatmul.mubr.f32.vlgmr.msra.gmra.mxu0 %v250_v58 }
 0x197   :  { %v251_v62 = vmax.f32 %v241_v61, 0.0 }
 0x199   :  { %506 = vmatprep.mubr.f32.mxu0 %v251_v62 }
 0x19a   :  { %507 = vmatmul.mubr.f32.gmra.mxu0 %v252_v63 }
 0x256   :  { %v505_v1 = vpop.f32.mrf.mxu0 }
 0x257   :  { %v348_v2 = vadd.f32 %v505_v1, %v376_v0 }
 0x258   :  { %v342_v3 = vpop.f32.mrf.mxu0 }
 0x259   :  { %363 = vst.msk [vmem:[%s695_s7 + $0x8] sm:$0xff] %vm361_vm1, %v348_v2  ;;  %v343_v4 = vadd.f32 %v376_v0, %v342_v3 }
 0x25a   :  { %v508_v5 = vpop.f32.mrf.mxu0 }
 0x25b   :  { %362 = vst.msk [vmem:[%s695_s7] sm:$0xff] %vm361_vm1, %v343_v4  ;;  %v358_v6 = vadd.f32 %v508_v5, %v376_v0 }
 0x25c   :  { %v352_v7 = vpop.f32.mrf.mxu0 }
 0x25d   :  { %365 = vst.msk [vmem:[%s695_s7 + $0x18] sm:$0xff] %vm361_vm1, %v358_v6  ;;  %v353_v8 = vadd.f32 %v376_v0, %v352_v7 }
 0x25f   :  { %364 = vst.msk [vmem:[%s695_s7 + $0x10] sm:$0xff] %vm361_vm1, %v353_v8 }

</bundles_post_ra>
